<compile_context>
chip_gen: v6e
topology: v6e:2x2x1
jax: 0.10.0
libtpu: 0.0.40
codegen_flags: <defaults>
</compile_context>

<pallas_src>
import functools

import jax
import jax.numpy as jnp
from jax.experimental import pallas as pl
from jax.experimental.pallas import tpu as pltpu


def _round_up(n, m):
    return ((n + m - 1) // m) * m


def _linear_kernel(x_ref, w_ref, b_ref, o_ref):
    # x_ref: (TILE_B, D) VMEM     w_ref: (1, D) VMEM (resident across grid)
    # b_ref: (1,)       SMEM      o_ref: (1, TILE_B) VMEM (lane-dense)
    x = x_ref[...]
    w = w_ref[...]                      # (1, D) broadcasts over the batch rows
    # VPU multiply + XLU reduce over the feature axis (no MXU push/pop, no w.T
    # relayout); accumulation stays in f32.
    y = jnp.sum(x * w, axis=1)          # (TILE_B,)
    y = y + b_ref[0]                    # scalar bias from SMEM
    o_ref[...] = y[None, :].astype(o_ref.dtype)


@functools.partial(jax.jit, static_argnames=("tile_b",))
def linear_regression_forward(x, weight, bias, *, tile_b=1024):
    """x: (B, D) f32, weight: (1, D) f32 (PyTorch layout), bias: (1,) f32 -> (B, 1) f32."""
    B, D = x.shape
    # Lane-dense output tiles must be a multiple of 128; shrink for tiny batches.
    tile_b = min(tile_b, _round_up(B, 128))
    b_padded = _round_up(B, tile_b)
    if b_padded != B:
        x = jnp.pad(x, ((0, b_padded - B), (0, 0)))
    num_tiles = b_padded // tile_b

    # NOTE: for large production batches this kernel is HBM-bandwidth bound;
    # feeding x as bf16 (still accumulating in f32 in-kernel) halves bytes moved.

    out = pl.pallas_call(
        _linear_kernel,
        out_shape=jax.ShapeDtypeStruct((1, b_padded), jnp.float32),
        grid_spec=pl.GridSpec(
            grid=(num_tiles,),
            in_specs=[
                pl.BlockSpec((tile_b, D), lambda i: (i, 0)),         # x batch tile
                pl.BlockSpec((1, D), lambda i: (0, 0)),              # weight, resident
                pl.BlockSpec(memory_space=pltpu.MemorySpace.SMEM),   # bias scalar
            ],
            out_specs=pl.BlockSpec((1, tile_b), lambda i: (0, i)),
        ),
        compiler_params=pltpu.CompilerParams(
            dimension_semantics=("parallel",),
        ),
    )(x, weight, bias.reshape(1))

    # Back to the PyTorch-compatible (B, 1) shape.
    return out.reshape(b_padded)[:B].reshape(B, 1)


if __name__ == "__main__":
    key = jax.random.PRNGKey(0)
    kx, kw, kb = jax.random.split(key, 3)

    B, D = 8, 32  # batch=8, input_dim=32
    x = jax.random.normal(kx, (B, D), dtype=jnp.float32)

    # Deterministic parameter init (mimicking nn.Linear's uniform init bound).
    bound = 1.0 / jnp.sqrt(D)
    weight = jax.random.uniform(kw, (1, D), minval=-bound, maxval=bound,
                                dtype=jnp.float32)
    bias = jax.random.uniform(kb, (1,), minval=-bound, maxval=bound,
                              dtype=jnp.float32)

    out = linear_regression_forward(x, weight, bias)
    jax.block_until_ready(out)

    # Sanity check against plain-JAX reference.
    ref = x @ weight.T + bias
    assert out.shape == (B, 1)
    assert jnp.allclose(out, ref, atol=1e-5, rtol=1e-5)

    print("KERNEL_OK")
</pallas_src>

<mosaic_0001>
module attributes {stable_mosaic.version = 11 : i64} {
  func.func @_linear_kernel(%arg0: i32, %arg1: memref<128x32xf32, #tpu.memory_space<vmem>>, %arg2: memref<1x32xf32, #tpu.memory_space<vmem>>, %arg3: memref<1xf32, #tpu.memory_space<smem>>, %arg4: memref<1x128xf32, #tpu.memory_space<vmem>>) attributes {dimension_semantics = [#tpu.dimension_semantics<parallel>], iteration_bounds = array<i64: 1>, scalar_prefetch = 0 : i64, scratch_operands = 0 : i64, tpu.core_type = #tpu.core_type<tc>, window_params = [{transform_indices = @transform_0, window_bounds = array<i64: 128, 32>}, {pipeline_mode = #tpu.pipeline_mode<synchronous>, transform_indices = @transform_1, window_bounds = array<i64: 1, 32>}, {transform_indices = @transform_2, window_bounds = array<i64: 1>}, {transform_indices = @transform_3, window_bounds = array<i64: 1, 128>}]} {
    %c0 = arith.constant 0 : index
    %c0_0 = arith.constant 0 : index
    %0 = vector.load %arg1[%c0, %c0_0] : memref<128x32xf32, #tpu.memory_space<vmem>>, vector<128x32xf32>
    %c0_1 = arith.constant 0 : index
    %c0_2 = arith.constant 0 : index
    %1 = vector.load %arg2[%c0_1, %c0_2] : memref<1x32xf32, #tpu.memory_space<vmem>>, vector<1x32xf32>
    %2 = vector.broadcast %1 : vector<1x32xf32> to vector<128x32xf32>
    %3 = arith.mulf %0, %2 : vector<128x32xf32>
    %cst = arith.constant dense<0.000000e+00> : vector<128xf32>
    %4 = vector.multi_reduction <add>, %3, %cst [1] : vector<128x32xf32> to vector<128xf32>
    %c0_3 = arith.constant 0 : index
    %5 = memref.load %arg3[%c0_3] : memref<1xf32, #tpu.memory_space<smem>>
    %6 = vector.broadcast %5 : f32 to vector<128xf32>
    %7 = arith.addf %4, %6 : vector<128xf32>
    %8 = vector.shape_cast %7 : vector<128xf32> to vector<1x128xf32>
    %c0_4 = arith.constant 0 : index
    %c0_5 = arith.constant 0 : index
    %9 = vector.load %arg4[%c0_4, %c0_5] : memref<1x128xf32, #tpu.memory_space<vmem>>, vector<1x128xf32>
    tpu.vector_store %arg4[%c0_4, %c0_5], %8 {strides = array<i32>} : memref<1x128xf32, #tpu.memory_space<vmem>>, vector<1x128xf32>,
    return
  }
  func.func @transform_0(%arg0: i32) -> (i32, i32) {
    %c0_i32 = arith.constant 0 : i32
    %c0_i32_0 = arith.constant 0 : i32
    return %arg0, %c0_i32 : i32, i32
  }
  func.func @transform_1(%arg0: i32) -> (i32, i32) {
    %c0_i32 = arith.constant 0 : i32
    %c0_i32_0 = arith.constant 0 : i32
    %c0_i32_1 = arith.constant 0 : i32
    return %c0_i32, %c0_i32_0 : i32, i32
  }
  func.func @transform_2(%arg0: i32) -> i32 {
    %c0_i32 = arith.constant 0 : i32
    %c0_i32_0 = arith.constant 0 : i32
    return %c0_i32 : i32
  }
  func.func @transform_3(%arg0: i32) -> (i32, i32) {
    %c0_i32 = arith.constant 0 : i32
    %c0_i32_0 = arith.constant 0 : i32
    return %c0_i32, %arg0 : i32, i32
  }
}

</mosaic_0001>

<bundles_post_ra>
// kernel: linear_regression_forward.1
= control target key start
LH: loop header
LB: loop body
LE: loop exit
PB: predicated region body
PF: predicated region fallthrough
CT: control target
= control target key end

     0   :  { %vm54_vm0 = vcmask 261120   ;;  %v137_v49 = vlaneseq  ;;  %vm148_vm1 = vcmask 130112   ;;  %vm155_vm2 = vcmask 195712   ;;  %s402_s0 = inlined_call_operand.vmem [shape: f32[128,32], index: 0, kind: input, shape index: {}]   ;;  %s403_s1 = inlined_call_operand.vmem [shape: f32[1,32], index: 1, kind: input, shape index: {}]   ;;  %s404_s2 = inlined_call_operand.<no memory space> [shape: f32[1], index: 2, kind: input, shape index: {}]   ;;  %s405_s3 = inlined_call_operand.vmem [shape: f32[1,128], index: 3, kind: output, shape index: {}]  }
   0x1   :  { %v15_v0 = vld [vmem:[%s402_s0] sm:$0xff]  ;;  %v17_v2 = vld [vmem:[%s402_s0 + $0x10] sm:$0xff]  ;;  %v16_v5 = vld [vmem:[%s402_s0 + $0x8] sm:$0xff]  ;;  %v351_v54 = vstv %s404_s2  ;;  %vm162_vm3 = vcmask 261312   ;;  %vm169_vm4 = vcmask 326912   ;;  %vm176_vm5 = vcmask 392512  }
   0x2   :  { %v254_v1 = vld [vmem:[%s403_s1] ss:$0 sm:$0xff]  ;;  %v18_v6 = vld [vmem:[%s402_s0 + $0x18] sm:$0xff]  ;;  %v20_v10 = vld [vmem:[%s402_s0 + $0x28] sm:$0xff]  ;;  %v342_v50 = vand.u32 127, %v137_v49  ;;  %v344_v51 = vshrl.u32 %v137_v49, 7 }
   0x3   :  { %v38_v3 = vmul.f32 %v254_v1, %v15_v0  ;;  %v40_v4 = vmul.f32 %v254_v1, %v17_v2  ;;  %v39_v7 = vmul.f32 %v254_v1, %v16_v5  ;;  %v41_v8 = vmul.f32 %v254_v1, %v18_v6  ;;  %v19_v9 = vld [vmem:[%s402_s0 + $0x20] sm:$0xff]  ;;  %v21_v17 = vld [vmem:[%s402_s0 + $0x30] sm:$0xff]  ;;  %v22_v18 = vld [vmem:[%s402_s0 + $0x38] sm:$0xff] }
   0x4   :  { %v42_v15 = vmul.f32 %v254_v1, %v19_v9  ;;  %v43_v16 = vmul.f32 %v254_v1, %v20_v10  ;;  %v44_v21 = vmul.f32 %v254_v1, %v21_v17  ;;  %v45_v22 = vmul.f32 %v254_v1, %v22_v18  ;;  %v23_v23 = vld [vmem:[%s402_s0 + $0x40] sm:$0xff]  ;;  %v24_v24 = vld [vmem:[%s402_s0 + $0x48] sm:$0xff]  ;;  %v25_v29 = vld [vmem:[%s402_s0 + $0x50] sm:$0xff] }
   0x5   :  { %v55_v11 = vsel %vm54_vm0, %v38_v3, 0.0  ;;  %v61_v12 = vsel %vm54_vm0, %v40_v4, 0.0  ;;  %v58_v13 = vsel %vm54_vm0, %v39_v7, 0.0  ;;  %v64_v14 = vsel %vm54_vm0, %v41_v8, 0.0  ;;  %v26_v30 = vld [vmem:[%s402_s0 + $0x58] sm:$0xff]  ;;  %v27_v35 = vld [vmem:[%s402_s0 + $0x60] sm:$0xff] }
   0x6   :  { %56 = vadd.xlane.f32.xlu0 %v55_v11  ;;  %62 = vadd.xlane.f32.xlu1 %v61_v12  ;;  %v67_v19 = vsel %vm54_vm0, %v42_v15, 0.0  ;;  %v70_v20 = vsel %vm54_vm0, %v43_v16, 0.0  ;;  %v73_v25 = vsel %vm54_vm0, %v44_v21, 0.0  ;;  %v76_v26 = vsel %vm54_vm0, %v45_v22, 0.0  ;;  %v28_v36 = vld [vmem:[%s402_s0 + $0x68] sm:$0xff]  ;;  %v29_v41 = vld [vmem:[%s402_s0 + $0x70] sm:$0xff] }
   0x7   :  { %v46_v27 = vmul.f32 %v254_v1, %v23_v23  ;;  %v47_v28 = vmul.f32 %v254_v1, %v24_v24  ;;  %v48_v33 = vmul.f32 %v254_v1, %v25_v29  ;;  %v49_v34 = vmul.f32 %v254_v1, %v26_v30  ;;  %v30_v42 = vld [vmem:[%s402_s0 + $0x78] sm:$0xff] }
   0x8   :  { %v50_v39 = vmul.f32 %v254_v1, %v27_v35  ;;  %v51_v40 = vmul.f32 %v254_v1, %v28_v36  ;;  %v52_v45 = vmul.f32 %v254_v1, %v29_v41  ;;  %v53_v46 = vmul.f32 %v254_v1, %v30_v42 }
   0x9   :  { %v79_v31 = vsel %vm54_vm0, %v46_v27, 0.0  ;;  %v82_v32 = vsel %vm54_vm0, %v47_v28, 0.0  ;;  %v85_v37 = vsel %vm54_vm0, %v48_v33, 0.0  ;;  %v88_v38 = vsel %vm54_vm0, %v49_v34, 0.0 }
   0xa   :  { %59 = vadd.xlane.f32.xlu0 %v58_v13  ;;  %65 = vadd.xlane.f32.xlu1 %v64_v14  ;;  %v91_v43 = vsel %vm54_vm0, %v50_v39, 0.0  ;;  %v94_v44 = vsel %vm54_vm0, %v51_v40, 0.0  ;;  %v97_v47 = vsel %vm54_vm0, %v52_v45, 0.0  ;;  %v100_v48 = vsel %vm54_vm0, %v53_v46, 0.0 }
   0xb   :  { %v143_v52 = vadd.s32 4294967288, %v342_v50  ;;  %v157_v53 = vadd.s32 4294967272, %v342_v50  ;;  %v150_v56 = vadd.s32 4294967280, %v342_v50  ;;  %v164_v58 = vadd.s32 4294967264, %v342_v50 }
   0xc   :  { %v141_v59 = vsub.s32 %v342_v50, %v344_v51  ;;  %v171_v3 = vadd.s32 4294967256, %v342_v50  ;;  %v178_v10 = vadd.s32 4294967248, %v342_v50  ;;  %v185_v15 = vadd.s32 4294967240, %v342_v50 }
   0xd   :  { %v146_v61 = vsub.s32 %v143_v52, %v344_v51  ;;  %v160_v62 = vsub.s32 %v157_v53, %v344_v51  ;;  %v153_v63 = vsub.s32 %v150_v56, %v344_v51  ;;  %v167_v6 = vsub.s32 %v164_v58, %v344_v51 }
   0xe   :  { %68 = vadd.xlane.f32.xlu0 %v67_v19  ;;  %71 = vadd.xlane.f32.xlu1 %v70_v20  ;;  %v174_v13 = vsub.s32 %v171_v3, %v344_v51  ;;  %v181_v22 = vsub.s32 %v178_v10, %v344_v51  ;;  %v192_v23 = vadd.s32 4294967232, %v342_v50  ;;  %v199_v28 = vadd.s32 4294967224, %v342_v50 }
   0xf   :  { %vm183_vm6 = vcmask 458112   ;;  %v206_v34 = vadd.s32 4294967216, %v342_v50  ;;  %v213_v40 = vadd.s32 4294967208, %v342_v50  ;;  %vm190_vm7 = vcmask 523712  }
  0x10   :  { %v195_v33 = vsub.s32 %v192_v23, %v344_v51  ;;  %vm197_vm8 = vcmask 589312   ;;  %v220_v46 = vadd.s32 4294967200, %v342_v50  ;;  %vm204_vm9 = vcmask 654912  }
  0x11   :  { %v209_v45 = vsub.s32 %v206_v34, %v344_v51  ;;  %v216_v52 = vsub.s32 %v213_v40, %v344_v51  ;;  %vm211_vm10 = vcmask 720512   ;;  %vm218_vm11 = vcmask 786112  }
  0x12   :  { %74 = vadd.xlane.f32.xlu0 %v73_v25  ;;  %77 = vadd.xlane.f32.xlu1 %v76_v26  ;;  %v188_v26 = vsub.s32 %v185_v15, %v344_v51  ;;  %vm225_vm12 = vcmask 851712   ;;  %vm232_vm13 = vcmask 917312   ;;  %vm239_vm14 = vcmask 982912  }
  0x13   :  { %vm246_vm15 = vcmask 1048512  }
  0x16   :  { %80 = vadd.xlane.f32.xlu0 %v79_v31  ;;  %83 = vadd.xlane.f32.xlu1 %v82_v32 }
  0x1a   :  { %86 = vadd.xlane.f32.xlu0 %v85_v37  ;;  %89 = vadd.xlane.f32.xlu1 %v88_v38  ;;  %v202_v38 = vsub.s32 %v199_v28, %v344_v51 }
  0x1e   :  { %92 = vadd.xlane.f32.xlu0 %v91_v43  ;;  %95 = vadd.xlane.f32.xlu1 %v94_v44 }
  0x22   :  { %98 = vadd.xlane.f32.xlu0 %v97_v47  ;;  %101 = vadd.xlane.f32.xlu1 %v100_v48 }
  0x8f   :  { %v57_v55 = vpop.xlane.xlu0 %56  ;;  %v63_v57 = vpop.xlane.xlu1 %62 }
  0x90   :  { %v105_v60 = vadd.f32 %v351_v54, %v57_v55  ;;  %v107_v0 = vadd.f32 %v351_v54, %v63_v57  ;;  %v227_v55 = vadd.s32 4294967192, %v342_v50 }
  0x92   :  { %v142_v7 = vrot.slane %v105_v60, %v141_v59  ;;  %v154_v11 = vrot.slane %v107_v0, %v153_v63  ;;  %v223_v60 = vsub.s32 %v220_v46, %v344_v51 }
  0x93   :  { %v60_v1 = vpop.xlane.xlu0 %59  ;;  %v66_v2 = vpop.xlane.xlu1 %65 }
  0x94   :  { %v106_v4 = vadd.f32 %v351_v54, %v60_v1  ;;  %v108_v5 = vadd.f32 %v351_v54, %v66_v2  ;;  %v230_v2 = vsub.s32 %v227_v55, %v344_v51 }
  0x96   :  { %v147_v8 = vrot.slane %v106_v4, %v146_v61  ;;  %v161_v9 = vrot.slane %v108_v5, %v160_v62  ;;  %v234_v61 = vadd.s32 4294967184, %v342_v50  ;;  %v241_v62 = vadd.s32 4294967176, %v342_v50 }
  0x97   :  { %v69_v12 = vpop.xlane.xlu0 %68  ;;  %v72_v14 = vpop.xlane.xlu1 %71 }
  0x98   :  { %v149_v16 = vsel %vm148_vm1, %v147_v8, %v142_v7  ;;  %v109_v17 = vadd.f32 %v351_v54, %v69_v12  ;;  %v110_v18 = vadd.f32 %v351_v54, %v72_v14  ;;  %v237_v8 = vsub.s32 %v234_v61, %v344_v51 }
  0x99   :  { %v156_v19 = vsel %vm155_vm2, %v154_v11, %v149_v16 }
  0x9a   :  { %v163_v20 = vsel %vm162_vm3, %v161_v9, %v156_v19  ;;  %v168_v21 = vrot.slane %v109_v17, %v167_v6  ;;  %v175_v24 = vrot.slane %v110_v18, %v174_v13  ;;  %v244_v9 = vsub.s32 %v241_v62, %v344_v51 }
  0x9b   :  { %v75_v25 = vpop.xlane.xlu0 %74  ;;  %v78_v27 = vpop.xlane.xlu1 %77 }
  0x9c   :  { %v170_v29 = vsel %vm169_vm4, %v168_v21, %v163_v20  ;;  %v111_v30 = vadd.f32 %v351_v54, %v75_v25  ;;  %v112_v31 = vadd.f32 %v351_v54, %v78_v27 }
  0x9d   :  { %v177_v35 = vsel %vm176_vm5, %v175_v24, %v170_v29 }
  0x9e   :  { %v182_v32 = vrot.slane %v111_v30, %v181_v22  ;;  %v189_v36 = vrot.slane %v112_v31, %v188_v26 }
  0x9f   :  { %v81_v37 = vpop.xlane.xlu0 %80  ;;  %v84_v39 = vpop.xlane.xlu1 %83 }
  0xa0   :  { %v184_v41 = vsel %vm183_vm6, %v182_v32, %v177_v35  ;;  %v113_v42 = vadd.f32 %v351_v54, %v81_v37  ;;  %v114_v43 = vadd.f32 %v351_v54, %v84_v39 }
  0xa1   :  { %v191_v47 = vsel %vm190_vm7, %v189_v36, %v184_v41 }
  0xa2   :  { %v196_v44 = vrot.slane %v113_v42, %v195_v33  ;;  %v203_v48 = vrot.slane %v114_v43, %v202_v38 }
  0xa3   :  { %v87_v49 = vpop.xlane.xlu0 %86  ;;  %v90_v53 = vpop.xlane.xlu1 %89 }
  0xa4   :  { %v198_v56 = vsel %vm197_vm8, %v196_v44, %v191_v47  ;;  %v115_v57 = vadd.f32 %v351_v54, %v87_v49  ;;  %v116_v58 = vadd.f32 %v351_v54, %v90_v53 }
  0xa5   :  { %v205_v63 = vsel %vm204_vm9, %v203_v48, %v198_v56 }
  0xa6   :  { %v210_v59 = vrot.slane %v115_v57, %v209_v45  ;;  %v217_v0 = vrot.slane %v116_v58, %v216_v52 }
  0xa7   :  { %v93_v1 = vpop.xlane.xlu0 %92  ;;  %v96_v3 = vpop.xlane.xlu1 %95 }
  0xa8   :  { %v212_v4 = vsel %vm211_vm10, %v210_v59, %v205_v63  ;;  %v117_v5 = vadd.f32 %v351_v54, %v93_v1  ;;  %v118_v6 = vadd.f32 %v351_v54, %v96_v3 }
  0xa9   :  { %v219_v10 = vsel %vm218_vm11, %v217_v0, %v212_v4 }
  0xaa   :  { %v224_v7 = vrot.slane %v117_v5, %v223_v60  ;;  %v231_v50 = vrot.slane %v118_v6, %v230_v2 }
  0xab   :  { %v99_v11 = vpop.xlane.xlu0 %98  ;;  %v102_v12 = vpop.xlane.xlu1 %101 }
  0xac   :  { %v226_v13 = vsel %vm225_vm12, %v224_v7, %v219_v10  ;;  %v119_v14 = vadd.f32 %v351_v54, %v99_v11  ;;  %v120_v15 = vadd.f32 %v351_v54, %v102_v12 }
  0xad   :  { %v233_v18 = vsel %vm232_vm13, %v231_v50, %v226_v13 }
  0xae   :  { %v238_v16 = vrot.slane %v119_v14, %v237_v8  ;;  %v245_v17 = vrot.slane %v120_v15, %v244_v9 }
  0xb0   :  { %v240_v19 = vsel %vm239_vm14, %v238_v16, %v233_v18 }
  0xb1   :  { %v247_v20 = vsel %vm246_vm15, %v245_v17, %v240_v19 }
  0xb2   :  { %249 = vst [vmem:[%s405_s3] sm:$0x1] %v247_v20 }

</bundles_post_ra>
